<compile_context>
chip_gen: v6e
topology: v6e:2x2x1
jax: 0.10.0
libtpu: 0.0.40
codegen_flags: <defaults>
</compile_context>

<pallas_src>
import jax
import jax.numpy as jnp
from jax.experimental import pallas as pl
from jax.experimental.pallas import tpu as pltpu


LEAKY_SLOPE = 0.01   # nn.LeakyReLU default negative_slope


def _leaky_relu(x):
    return jnp.where(x > 0, x, LEAKY_SLOPE * x)


def _round_up(n, m):
    return ((n + m - 1) // m) * m


def critic_kernel(x_ref, a_ref, w1s_ref, w1a_ref, b1_ref,
                  w2_ref, b2_ref, w3_ref, b3_ref, o_ref):
    """Whole MLP for one batch tile: three MXU matmuls + f32 VPU LeakyReLU."""
    w_dtype = w2_ref.dtype

    # fc1: state/action concat fused as x @ W1_s + a @ W1_a (split weights).
    h1 = (jnp.dot(x_ref[...], w1s_ref[...], preferred_element_type=jnp.float32)
          + jnp.dot(a_ref[...], w1a_ref[...], preferred_element_type=jnp.float32)
          + b1_ref[...])
    h1 = _leaky_relu(h1)

    # fc2 (lane-dense Hp x Hp).
    h2 = (jnp.dot(h1.astype(w_dtype), w2_ref[...],
                  preferred_element_type=jnp.float32) + b2_ref[...])
    h2 = _leaky_relu(h2)

    # fc3: narrow (tb, 1) result -> only 4 B/row of HBM writeback.
    out = (jnp.dot(h2.astype(w_dtype), w3_ref[...],
                   preferred_element_type=jnp.float32) + b3_ref[...])
    o_ref[...] = out.astype(o_ref.dtype)


def _choose_batch_tile(B, block_b):
    """Pick (tb, Bp, n_tiles): tb multiple of 8, small padding waste,
    and >= 2 grid steps whenever the batch can be split (v7x megacore)."""
    B8 = _round_up(B, 8)
    n_tiles = pl.cdiv(B8, block_b)
    if n_tiles == 1 and B8 >= 16:
        n_tiles = 2
    tb = _round_up(pl.cdiv(B8, n_tiles), 8)
    n_tiles = pl.cdiv(B8, tb)
    return tb, tb * n_tiles, n_tiles


def critic_forward(x, a, params, *, block_b=2048, compute_dtype=jnp.bfloat16):
    """x: (B, nb_states), a: (B, nb_actions) -> (B, 1) float32."""
    w1, b1, w2, b2, w3, b3 = params
    B, S = x.shape
    A = a.shape[1]
    H = w1.shape[1]
    Hp = _round_up(H, 128)          # lane-dense hidden dimension
    pad_h = Hp - H

    # --- parameter prep (pad hidden dim, split fc1, cast) -------------------
    # (In a training loop these would be pre-padded/cast once, not per call.)
    w1p = jnp.pad(w1, ((0, 0), (0, pad_h)))
    w1s = w1p[:S].astype(compute_dtype)                                 # (S, Hp)
    w1a = w1p[S:].astype(compute_dtype)                                 # (A, Hp)
    b1p = jnp.pad(b1, ((0, 0), (0, pad_h)))                             # (1, Hp) f32
    w2p = jnp.pad(w2, ((0, pad_h), (0, pad_h))).astype(compute_dtype)   # (Hp, Hp)
    b2p = jnp.pad(b2, ((0, 0), (0, pad_h)))                             # (1, Hp) f32
    w3p = jnp.pad(w3, ((0, pad_h), (0, 0))).astype(compute_dtype)       # (Hp, 1)
    b3f = b3.astype(jnp.float32)                                        # (1, 1)

    # --- batch tiling --------------------------------------------------------
    tb, Bp, n_tiles = _choose_batch_tile(B, block_b)
    xc = x.astype(compute_dtype)
    ac = a.astype(compute_dtype)
    if Bp != B:
        xc = jnp.pad(xc, ((0, Bp - B), (0, 0)))
        ac = jnp.pad(ac, ((0, Bp - B), (0, 0)))

    batch_spec = lambda c: pl.BlockSpec((tb, c), lambda i: (i, 0))
    # Constant index_map -> weights/biases stay VMEM-resident across the grid.
    const_spec = lambda arr: pl.BlockSpec(arr.shape, lambda i: (0, 0))

    in_bytes = jnp.dtype(compute_dtype).itemsize
    w_elems = w1s.size + w1a.size + w2p.size + w3p.size
    flops = 2 * Bp * Hp * (S + A + Hp + 1)
    bytes_accessed = (Bp * (S + A) * in_bytes            # activation reads
                      + Bp * 4                           # (Bp, 1) f32 output
                      + w_elems * in_bytes               # one-time weight fetch
                      + (b1p.size + b2p.size + b3f.size) * 4)

    # Rough VMEM budget: double-buffered batch tiles + resident weights +
    # f32 intermediates; clamp to 48 MiB (within v7x's 64 MiB physical VMEM).
    vmem_est = (2 * 2 * tb * (S + A) * in_bytes
                + 2 * tb * 4
                + 2 * w_elems * in_bytes
                + (b1p.size + b2p.size + b3f.size) * 4
                + 4 * tb * Hp * 4)
    vmem_limit = int(min(max(2 * vmem_est, 32 * 1024 * 1024), 48 * 1024 * 1024))

    out = pl.pallas_call(
        critic_kernel,
        out_shape=jax.ShapeDtypeStruct((Bp, 1), jnp.float32),
        grid=(n_tiles,),
        in_specs=[batch_spec(S), batch_spec(A),
                  const_spec(w1s), const_spec(w1a), const_spec(b1p),
                  const_spec(w2p), const_spec(b2p),
                  const_spec(w3p), const_spec(b3f)],
        out_specs=pl.BlockSpec((tb, 1), lambda i: (i, 0)),
        compiler_params=pltpu.CompilerParams(
            dimension_semantics=("parallel",),
            vmem_limit_bytes=vmem_limit),
        cost_estimate=pl.CostEstimate(
            flops=flops, transcendentals=0, bytes_accessed=bytes_accessed),
    )(xc, ac, w1s, w1a, b1p, w2p, b2p, w3p, b3f)

    return out[:B]


def init_critic_params(key, nb_states, nb_actions, hidden):
    """Deterministic synthetic init mirroring the PyTorch __init__ recipes."""
    in1 = nb_states + nb_actions
    k1, k2, k3, kb1, kb2, kb3 = jax.random.split(key, 6)

    # kaiming_normal_(fan_in, leaky_relu): std = gain / sqrt(fan_in),
    # gain = sqrt(2 / (1 + 0.01**2))
    gain = (2.0 / (1.0 + 0.01 ** 2)) ** 0.5
    w1 = jax.random.normal(k1, (in1, hidden), jnp.float32) * (gain / in1 ** 0.5)
    w2 = jax.random.normal(k2, (hidden, hidden), jnp.float32) * (gain / hidden ** 0.5)

    # xavier_uniform_ with gain=1: limit = sqrt(6 / (fan_in + fan_out))
    lim3 = (6.0 / (hidden + 1)) ** 0.5
    w3 = jax.random.uniform(k3, (hidden, 1), jnp.float32, -lim3, lim3)

    # nn.Linear default bias init: U(-1/sqrt(fan_in), 1/sqrt(fan_in))
    b1 = jax.random.uniform(kb1, (1, hidden), jnp.float32,
                            -1.0 / in1 ** 0.5, 1.0 / in1 ** 0.5)
    b2 = jax.random.uniform(kb2, (1, hidden), jnp.float32,
                            -1.0 / hidden ** 0.5, 1.0 / hidden ** 0.5)
    b3 = jax.random.uniform(kb3, (1, 1), jnp.float32,
                            -1.0 / hidden ** 0.5, 1.0 / hidden ** 0.5)
    return (w1, b1, w2, b2, w3, b3)


def critic_reference(x, a, params):
    """Pure-JAX reference for correctness check."""
    w1, b1, w2, b2, w3, b3 = params
    xa = jnp.concatenate([x, a], axis=1)
    h1 = _leaky_relu(xa @ w1 + b1)
    h2 = _leaky_relu(h1 @ w2 + b2)
    return h2 @ w3 + b3


if __name__ == "__main__":
    batch, nb_states, nb_actions, hidden = 2, 4, 4, 32

    key = jax.random.PRNGKey(0)
    kx, ka, kp = jax.random.split(key, 3)
    x = jax.random.normal(kx, (batch, nb_states), jnp.float32)
    a = jax.random.normal(ka, (batch, nb_actions), jnp.float32)
    params = init_critic_params(kp, nb_states, nb_actions, hidden)

    ref = critic_reference(x, a, params)

    # Exact f32 path: tight check against the pure-JAX reference.
    out_f32 = jax.block_until_ready(
        critic_forward(x, a, params, compute_dtype=jnp.float32))
    assert out_f32.shape == (batch, 1), out_f32.shape
    assert jnp.allclose(out_f32, ref, atol=1e-5, rtol=1e-5), (out_f32, ref)

    # Default bf16-operand path (f32 accumulation): looser check.
    out_bf16 = jax.block_until_ready(critic_forward(x, a, params))
    assert out_bf16.shape == (batch, 1), out_bf16.shape
    assert jnp.allclose(out_bf16, ref, atol=5e-2, rtol=5e-2), (out_bf16, ref)

    # Multi-tile / padded-batch path (exercises a multi-step "parallel" grid).
    batch2 = 37
    kx2, ka2 = jax.random.split(jax.random.PRNGKey(1), 2)
    x2 = jax.random.normal(kx2, (batch2, nb_states), jnp.float32)
    a2 = jax.random.normal(ka2, (batch2, nb_actions), jnp.float32)
    out2 = jax.block_until_ready(
        critic_forward(x2, a2, params, block_b=16, compute_dtype=jnp.float32))
    ref2 = critic_reference(x2, a2, params)
    assert out2.shape == (batch2, 1), out2.shape
    assert jnp.allclose(out2, ref2, atol=1e-5, rtol=1e-5), (out2, ref2)

    print("KERNEL_OK")
</pallas_src>

<mosaic_0001>
module attributes {stable_mosaic.version = 11 : i64} {
  func.func @critic_kernel(%arg0: i32, %arg1: memref<8x4xf32, #tpu.memory_space<vmem>>, %arg2: memref<8x4xf32, #tpu.memory_space<vmem>>, %arg3: memref<4x128xf32, #tpu.memory_space<vmem>>, %arg4: memref<4x128xf32, #tpu.memory_space<vmem>>, %arg5: memref<1x128xf32, #tpu.memory_space<vmem>>, %arg6: memref<128x128xf32, #tpu.memory_space<vmem>>, %arg7: memref<1x128xf32, #tpu.memory_space<vmem>>, %arg8: memref<128x1xf32, #tpu.memory_space<vmem>>, %arg9: memref<1x1xf32, #tpu.memory_space<vmem>>, %arg10: memref<8x1xf32, #tpu.memory_space<vmem>>) attributes {dimension_semantics = [#tpu.dimension_semantics<parallel>], iteration_bounds = array<i64: 1>, scalar_prefetch = 0 : i64, scratch_operands = 0 : i64, tpu.core_type = #tpu.core_type<tc>, window_params = [{transform_indices = @transform_0, window_bounds = array<i64: 8, 4>}, {transform_indices = @transform_1, window_bounds = array<i64: 8, 4>}, {pipeline_mode = #tpu.pipeline_mode<synchronous>, transform_indices = @transform_2, window_bounds = array<i64: 4, 128>}, {pipeline_mode = #tpu.pipeline_mode<synchronous>, transform_indices = @transform_3, window_bounds = array<i64: 4, 128>}, {pipeline_mode = #tpu.pipeline_mode<synchronous>, transform_indices = @transform_4, window_bounds = array<i64: 1, 128>}, {pipeline_mode = #tpu.pipeline_mode<synchronous>, transform_indices = @transform_5, window_bounds = array<i64: 128, 128>}, {pipeline_mode = #tpu.pipeline_mode<synchronous>, transform_indices = @transform_6, window_bounds = array<i64: 1, 128>}, {pipeline_mode = #tpu.pipeline_mode<synchronous>, transform_indices = @transform_7, window_bounds = array<i64: 128, 1>}, {pipeline_mode = #tpu.pipeline_mode<synchronous>, transform_indices = @transform_8, window_bounds = array<i64: 1, 1>}, {transform_indices = @transform_9, window_bounds = array<i64: 8, 1>}]} {
    %c0 = arith.constant 0 : index
    %c0_0 = arith.constant 0 : index
    %0 = vector.load %arg1[%c0, %c0_0] : memref<8x4xf32, #tpu.memory_space<vmem>>, vector<8x4xf32>
    %c0_1 = arith.constant 0 : index
    %c0_2 = arith.constant 0 : index
    %1 = vector.load %arg3[%c0_1, %c0_2] : memref<4x128xf32, #tpu.memory_space<vmem>>, vector<4x128xf32>
    %cst = arith.constant dense<0.000000e+00> : vector<8x128xf32>
    %2 = tpu.matmul %0, %1, %cst {dimension_numbers = #tpu.dot_dimension_numbers<[1], [0], [0], [1], [0, 0, 1, 1], [], []>} : vector<8x4xf32>, vector<4x128xf32>, vector<8x128xf32> -> vector<8x128xf32>
    %c0_3 = arith.constant 0 : index
    %c0_4 = arith.constant 0 : index
    %3 = vector.load %arg2[%c0_3, %c0_4] : memref<8x4xf32, #tpu.memory_space<vmem>>, vector<8x4xf32>
    %c0_5 = arith.constant 0 : index
    %c0_6 = arith.constant 0 : index
    %4 = vector.load %arg4[%c0_5, %c0_6] : memref<4x128xf32, #tpu.memory_space<vmem>>, vector<4x128xf32>
    %cst_7 = arith.constant dense<0.000000e+00> : vector<8x128xf32>
    %5 = tpu.matmul %3, %4, %cst_7 {dimension_numbers = #tpu.dot_dimension_numbers<[1], [0], [0], [1], [0, 0, 1, 1], [], []>} : vector<8x4xf32>, vector<4x128xf32>, vector<8x128xf32> -> vector<8x128xf32>
    %6 = arith.addf %2, %5 : vector<8x128xf32>
    %c0_8 = arith.constant 0 : index
    %c0_9 = arith.constant 0 : index
    %7 = vector.load %arg5[%c0_8, %c0_9] : memref<1x128xf32, #tpu.memory_space<vmem>>, vector<1x128xf32>
    %8 = vector.broadcast %7 : vector<1x128xf32> to vector<8x128xf32>
    %9 = arith.addf %6, %8 : vector<8x128xf32>
    %cst_10 = arith.constant 0.000000e+00 : f32
    %10 = vector.broadcast %cst_10 : f32 to vector<8x128xf32>
    %11 = arith.cmpf ogt, %9, %10 : vector<8x128xf32>
    %cst_11 = arith.constant 0.00999999977 : f32
    %12 = vector.broadcast %cst_11 : f32 to vector<8x128xf32>
    %13 = arith.mulf %12, %9 : vector<8x128xf32>
    %14 = arith.select %11, %9, %13 : vector<8x128xi1>, vector<8x128xf32>
    %c0_12 = arith.constant 0 : index
    %c0_13 = arith.constant 0 : index
    %15 = vector.load %arg6[%c0_12, %c0_13] : memref<128x128xf32, #tpu.memory_space<vmem>>, vector<128x128xf32>
    %cst_14 = arith.constant dense<0.000000e+00> : vector<8x128xf32>
    %16 = tpu.matmul %14, %15, %cst_14 {dimension_numbers = #tpu.dot_dimension_numbers<[1], [0], [0], [1], [0, 0, 1, 1], [], []>} : vector<8x128xf32>, vector<128x128xf32>, vector<8x128xf32> -> vector<8x128xf32>
    %c0_15 = arith.constant 0 : index
    %c0_16 = arith.constant 0 : index
    %17 = vector.load %arg7[%c0_15, %c0_16] : memref<1x128xf32, #tpu.memory_space<vmem>>, vector<1x128xf32>
    %18 = vector.broadcast %17 : vector<1x128xf32> to vector<8x128xf32>
    %19 = arith.addf %16, %18 : vector<8x128xf32>
    %cst_17 = arith.constant 0.000000e+00 : f32
    %20 = vector.broadcast %cst_17 : f32 to vector<8x128xf32>
    %21 = arith.cmpf ogt, %19, %20 : vector<8x128xf32>
    %cst_18 = arith.constant 0.00999999977 : f32
    %22 = vector.broadcast %cst_18 : f32 to vector<8x128xf32>
    %23 = arith.mulf %22, %19 : vector<8x128xf32>
    %24 = arith.select %21, %19, %23 : vector<8x128xi1>, vector<8x128xf32>
    %c0_19 = arith.constant 0 : index
    %c0_20 = arith.constant 0 : index
    %25 = vector.load %arg8[%c0_19, %c0_20] : memref<128x1xf32, #tpu.memory_space<vmem>>, vector<128x1xf32>
    %cst_21 = arith.constant dense<0.000000e+00> : vector<8x1xf32>
    %26 = tpu.matmul %24, %25, %cst_21 {dimension_numbers = #tpu.dot_dimension_numbers<[1], [0], [0], [1], [0, 0, 1, 1], [], []>} : vector<8x128xf32>, vector<128x1xf32>, vector<8x1xf32> -> vector<8x1xf32>
    %c0_22 = arith.constant 0 : index
    %c0_23 = arith.constant 0 : index
    %27 = vector.load %arg9[%c0_22, %c0_23] : memref<1x1xf32, #tpu.memory_space<vmem>>, vector<1x1xf32>
    %28 = vector.broadcast %27 : vector<1x1xf32> to vector<8x1xf32>
    %29 = arith.addf %26, %28 : vector<8x1xf32>
    %c0_24 = arith.constant 0 : index
    %c0_25 = arith.constant 0 : index
    %30 = vector.load %arg10[%c0_24, %c0_25] : memref<8x1xf32, #tpu.memory_space<vmem>>, vector<8x1xf32>
    tpu.vector_store %arg10[%c0_24, %c0_25], %29 {strides = array<i32>} : memref<8x1xf32, #tpu.memory_space<vmem>>, vector<8x1xf32>,
    return
  }
  func.func @transform_0(%arg0: i32) -> (i32, i32) {
    %c0_i32 = arith.constant 0 : i32
    %c0_i32_0 = arith.constant 0 : i32
    return %arg0, %c0_i32 : i32, i32
  }
  func.func @transform_1(%arg0: i32) -> (i32, i32) {
    %c0_i32 = arith.constant 0 : i32
    %c0_i32_0 = arith.constant 0 : i32
    return %arg0, %c0_i32 : i32, i32
  }
  func.func @transform_2(%arg0: i32) -> (i32, i32) {
    %c0_i32 = arith.constant 0 : i32
    %c0_i32_0 = arith.constant 0 : i32
    %c0_i32_1 = arith.constant 0 : i32
    return %c0_i32, %c0_i32_0 : i32, i32
  }
  func.func @transform_3(%arg0: i32) -> (i32, i32) {
    %c0_i32 = arith.constant 0 : i32
    %c0_i32_0 = arith.constant 0 : i32
    %c0_i32_1 = arith.constant 0 : i32
    return %c0_i32, %c0_i32_0 : i32, i32
  }
  func.func @transform_4(%arg0: i32) -> (i32, i32) {
    %c0_i32 = arith.constant 0 : i32
    %c0_i32_0 = arith.constant 0 : i32
    %c0_i32_1 = arith.constant 0 : i32
    return %c0_i32, %c0_i32_0 : i32, i32
  }
  func.func @transform_5(%arg0: i32) -> (i32, i32) {
    %c0_i32 = arith.constant 0 : i32
    %c0_i32_0 = arith.constant 0 : i32
    %c0_i32_1 = arith.constant 0 : i32
    return %c0_i32, %c0_i32_0 : i32, i32
  }
  func.func @transform_6(%arg0: i32) -> (i32, i32) {
    %c0_i32 = arith.constant 0 : i32
    %c0_i32_0 = arith.constant 0 : i32
    %c0_i32_1 = arith.constant 0 : i32
    return %c0_i32, %c0_i32_0 : i32, i32
  }
  func.func @transform_7(%arg0: i32) -> (i32, i32) {
    %c0_i32 = arith.constant 0 : i32
    %c0_i32_0 = arith.constant 0 : i32
    %c0_i32_1 = arith.constant 0 : i32
    return %c0_i32, %c0_i32_0 : i32, i32
  }
  func.func @transform_8(%arg0: i32) -> (i32, i32) {
    %c0_i32 = arith.constant 0 : i32
    %c0_i32_0 = arith.constant 0 : i32
    %c0_i32_1 = arith.constant 0 : i32
    return %c0_i32, %c0_i32_0 : i32, i32
  }
  func.func @transform_9(%arg0: i32) -> (i32, i32) {
    %c0_i32 = arith.constant 0 : i32
    %c0_i32_0 = arith.constant 0 : i32
    return %arg0, %c0_i32 : i32, i32
  }
}

</mosaic_0001>

<bundles_post_ra>
// kernel: tpu_custom_call.1
= control target key start
LH: loop header
LB: loop body
LE: loop exit
PB: predicated region body
PF: predicated region fallthrough
CT: control target
= control target key end

     0   :  { %vm42_vm0 = vcmask 1043456   ;;  %v525_v0 = vmov 0.0   ;;  %vm38_vm1 = vcmask 31744   ;;  %vm526_vm2 = vmmov 0   ;;  %s737_s3 = inlined_call_operand.vmem [shape: f32[4,128], index: 3, kind: input, shape index: {}]   ;;  %s738_s2 = inlined_call_operand.vmem [shape: f32[4,128], index: 2, kind: input, shape index: {}]   ;;  %s739_s1 = inlined_call_operand.vmem [shape: f32[8,4], index: 1, kind: input, shape index: {}]   ;;  %s740_s0 = inlined_call_operand.vmem [shape: f32[8,4], index: 0, kind: input, shape index: {}]   ;;  %s741_s5 = inlined_call_operand.vmem [shape: f32[128,128], index: 5, kind: input, shape index: {}]   ;;  %s742_s7 = inlined_call_operand.vmem [shape: f32[128,1], index: 7, kind: input, shape index: {}]   ;;  %s743_s4 = inlined_call_operand.vmem [shape: f32[1,128], index: 4, kind: input, shape index: {}]   ;;  %s744_s8 = inlined_call_operand.<no memory space> [shape: f32[1,1], index: 8, kind: input, shape index: {}]   ;;  %s745_s6 = inlined_call_operand.vmem [shape: f32[1,128], index: 6, kind: input, shape index: {}]   ;;  %s746_s9 = inlined_call_operand.vmem [shape: f32[8,1], index: 9, kind: output, shape index: {}]  }
   0x1   :  { %443 = vmatprep.subr.mxu0 %v525_v0  ;;  %448 = vmatprep.subr.mxu1 %v525_v0  ;;  %v37_v1 = vld [vmem:[%s737_s3] sm:$0xf]  ;;  %v218_v5 = vld [vmem:[%s741_s5 + $0x78] sm:$0xff]  ;;  %v217_v6 = vld [vmem:[%s741_s5 + $0x70] sm:$0xff]  ;;  %v14_v46 = vstv %s744_s8  ;;  %vm392_vm5 = vcmask 7168  }
   0x2   :  { %v35_v2 = vld [vmem:[%s738_s2] sm:$0xf]  ;;  %444 = vmatpush3.msk.msra.mxu0 %vm42_vm0, %v37_v1  ;;  %445 = vmatprep.mubr.msk.f32.mxu0 %vm526_vm2, %v525_v0  ;;  %v216_v7 = vld [vmem:[%s741_s5 + $0x68] sm:$0xff]  ;;  %v214_v9 = vld [vmem:[%s741_s5 + $0x58] sm:$0xff]  ;;  %15 = vst [vmem:[#allocation2] sm:$0x1] %v14_v46 }
   0x3   :  { %v36_v3 = vld [vmem:[%s739_s1] sm:$0xff]  ;;  %449 = vmatpush3.msk.msra.mxu1 %vm42_vm0, %v35_v2  ;;  %450 = vmatprep.mubr.msk.f32.mxu1 %vm526_vm2, %v525_v0  ;;  %v213_v10 = vld [vmem:[%s741_s5 + $0x50] sm:$0xff]  ;;  %v212_v11 = vld [vmem:[%s741_s5 + $0x48] sm:$0xff] }
   0x4   :  { %v34_v4 = vld [vmem:[%s740_s0] sm:$0xff]  ;;  %446 = vmatmul.mubr.msk.f32.vlgmr.msra.gmra.mxu0 %vm38_vm1, %v36_v3  ;;  %453 = vmatprep.subr.mxu0 %v525_v0  ;;  %v210_v13 = vld [vmem:[%s741_s5 + $0x38] sm:$0xff]  ;;  %v209_v14 = vld [vmem:[%s741_s5 + $0x30] sm:$0xff] }
   0x5   :  { %451 = vmatmul.mubr.msk.f32.vlgmr.msra.gmra.mxu1 %vm38_vm1, %v34_v4  ;;  %485 = vmatprep.mubr.msk.f32.mxu0 %vm526_vm2, %v525_v0  ;;  %v215_v8 = vld [vmem:[%s741_s5 + $0x60] sm:$0xff]  ;;  %v208_v15 = vld [vmem:[%s741_s5 + $0x28] sm:$0xff]  ;;  %v206_v17 = vld [vmem:[%s741_s5 + $0x18] sm:$0xff] }
   0x6   :  { %454 = vmatpush3.msra.mxu0 %v218_v5  ;;  %488 = vmatprep.subr.mxu1 %v525_v0  ;;  %v211_v12 = vld [vmem:[%s741_s5 + $0x40] sm:$0xff]  ;;  %v205_v18 = vld [vmem:[%s741_s5 + $0x10] sm:$0xff]  ;;  %v204_v19 = vld [vmem:[%s741_s5 + $0x8] sm:$0xff] }
   0x7   :  { %455 = vmatprep.subr.mxu0 %v525_v0  ;;  %520 = vmatprep.mubr.msk.f32.mxu1 %vm526_vm2, %v525_v0  ;;  %v207_v16 = vld [vmem:[%s741_s5 + $0x20] sm:$0xff]  ;;  %v314_v21 = vld [vmem:[%s742_s7 + $0x78] sm:$0xff]  ;;  %v313_v22 = vld [vmem:[%s742_s7 + $0x70] sm:$0xff] }
   0x8   :  { %456 = vmatpush3.msra.mxu0 %v217_v6  ;;  %v203_v20 = vld [vmem:[%s741_s5] sm:$0xff]  ;;  %489 = vmatpush3.msra.mxu1 %v314_v21  ;;  %v312_v23 = vld [vmem:[%s742_s7 + $0x68] sm:$0xff]  ;;  %v310_v25 = vld [vmem:[%s742_s7 + $0x58] sm:$0xff] }
   0x9   :  { %457 = vmatprep.subr.mxu0 %v525_v0  ;;  %490 = vmatprep.subr.mxu1 %v525_v0  ;;  %v311_v24 = vld [vmem:[%s742_s7 + $0x60] sm:$0xff]  ;;  %v309_v26 = vld [vmem:[%s742_s7 + $0x50] sm:$0xff]  ;;  %v308_v27 = vld [vmem:[%s742_s7 + $0x48] sm:$0xff] }
   0xa   :  { %458 = vmatpush3.msra.mxu0 %v216_v7  ;;  %491 = vmatpush3.msra.mxu1 %v313_v22  ;;  %v307_v28 = vld [vmem:[%s742_s7 + $0x40] sm:$0xff]  ;;  %v306_v29 = vld [vmem:[%s742_s7 + $0x38] sm:$0xff]  ;;  %v305_v30 = vld [vmem:[%s742_s7 + $0x30] sm:$0xff] }
   0xb   :  { %459 = vmatprep.subr.mxu0 %v525_v0  ;;  %492 = vmatprep.subr.mxu1 %v525_v0  ;;  %v304_v31 = vld [vmem:[%s742_s7 + $0x28] sm:$0xff]  ;;  %v303_v32 = vld [vmem:[%s742_s7 + $0x20] sm:$0xff]  ;;  %v302_v33 = vld [vmem:[%s742_s7 + $0x18] sm:$0xff] }
   0xc   :  { %460 = vmatpush3.msra.mxu0 %v215_v8  ;;  %493 = vmatpush3.msra.mxu1 %v312_v23  ;;  %v402_v36 = vld [vmem:[%s743_s4] ss:$0 sm:$0xff]  ;;  %v301_v43 = vld [vmem:[%s742_s7 + $0x10] sm:$0xff]  ;;  %v300_v44 = vld [vmem:[%s742_s7 + $0x8] sm:$0xff] }
   0xd   :  { %461 = vmatprep.subr.mxu0 %v525_v0  ;;  %494 = vmatprep.subr.mxu1 %v525_v0  ;;  %v299_v45 = vld [vmem:[%s742_s7] sm:$0xff] }
   0xe   :  { %462 = vmatpush3.msra.mxu0 %v214_v9  ;;  %495 = vmatpush3.msra.mxu1 %v311_v24  ;;  %v403_v47 = vld [vmem:[%s745_s6] ss:$0 sm:$0xff] }
   0xf   :  { %463 = vmatprep.subr.mxu0 %v525_v0  ;;  %496 = vmatprep.subr.mxu1 %v525_v0  ;;  %v404_v53 = vld [vmem:[#allocation2] ss:$0 sm:$0xff] }
  0x10   :  { %464 = vmatpush3.msra.mxu0 %v213_v10  ;;  %497 = vmatpush3.msra.mxu1 %v310_v25 }
  0x11   :  { %465 = vmatprep.subr.mxu0 %v525_v0  ;;  %498 = vmatprep.subr.mxu1 %v525_v0 }
  0x12   :  { %466 = vmatpush3.msra.mxu0 %v212_v11  ;;  %499 = vmatpush3.msra.mxu1 %v309_v26 }
  0x13   :  { %467 = vmatprep.subr.mxu0 %v525_v0  ;;  %500 = vmatprep.subr.mxu1 %v525_v0 }
  0x14   :  { %468 = vmatpush3.msra.mxu0 %v211_v12  ;;  %501 = vmatpush3.msra.mxu1 %v308_v27 }
  0x15   :  { %469 = vmatprep.subr.mxu0 %v525_v0  ;;  %502 = vmatprep.subr.mxu1 %v525_v0 }
  0x16   :  { %470 = vmatpush3.msra.mxu0 %v210_v13  ;;  %503 = vmatpush3.msra.mxu1 %v307_v28 }
  0x17   :  { %471 = vmatprep.subr.mxu0 %v525_v0  ;;  %504 = vmatprep.subr.mxu1 %v525_v0 }
  0x18   :  { %472 = vmatpush3.msra.mxu0 %v209_v14  ;;  %505 = vmatpush3.msra.mxu1 %v306_v29 }
  0x19   :  { %473 = vmatprep.subr.mxu0 %v525_v0  ;;  %506 = vmatprep.subr.mxu1 %v525_v0 }
  0x1a   :  { %474 = vmatpush3.msra.mxu0 %v208_v15  ;;  %507 = vmatpush3.msra.mxu1 %v305_v30 }
  0x1b   :  { %475 = vmatprep.subr.mxu0 %v525_v0  ;;  %508 = vmatprep.subr.mxu1 %v525_v0 }
  0x1c   :  { %476 = vmatpush3.msra.mxu0 %v207_v16  ;;  %509 = vmatpush3.msra.mxu1 %v304_v31 }
  0x1d   :  { %477 = vmatprep.subr.mxu0 %v525_v0  ;;  %510 = vmatprep.subr.mxu1 %v525_v0 }
  0x1e   :  { %478 = vmatpush3.msra.mxu0 %v206_v17  ;;  %511 = vmatpush3.msra.mxu1 %v303_v32 }
  0x1f   :  { %479 = vmatprep.subr.mxu0 %v525_v0  ;;  %512 = vmatprep.subr.mxu1 %v525_v0 }
  0x20   :  { %480 = vmatpush3.msra.mxu0 %v205_v18  ;;  %513 = vmatpush3.msra.mxu1 %v302_v33 }
  0x21   :  { %481 = vmatprep.subr.mxu0 %v525_v0  ;;  %514 = vmatprep.subr.mxu1 %v525_v0 }
  0x22   :  { %482 = vmatpush3.msra.mxu0 %v204_v19  ;;  %515 = vmatpush3.msra.mxu1 %v301_v43 }
  0x23   :  { %483 = vmatprep.subr.mxu0 %v525_v0  ;;  %516 = vmatprep.subr.mxu1 %v525_v0 }
  0x24   :  { %484 = vmatpush3.msra.mxu0 %v203_v20  ;;  %517 = vmatpush3.msra.mxu1 %v300_v44 }
  0x25   :  { %518 = vmatprep.subr.mxu1 %v525_v0 }
  0x26   :  { %519 = vmatpush3.msra.mxu1 %v299_v45 }
  0xc4   :  { %v112_v34 = vpop.f32.mrf.mxu0 }
  0xc5   :  { %v188_v35 = vpop.f32.mrf.mxu1 }
  0xc6   :  { %v189_v37 = vadd.f32 %v188_v35, %v112_v34  ;;  %v447_v38 = vpop.f32.mrf.mxu0 }
  0xc7   :  { %v452_v39 = vpop.f32.mrf.mxu1 }
  0xc8   :  { %v199_v40 = vadd.f32 %v402_v36, %v189_v37 }
  0xca   :  { %v201_v41 = vmul.f32 0.01, %v199_v40  ;;  %vm200_vm3 = vcmp.gt.f32.partialorder %v199_v40, 0.0 }
  0xcc   :  { %v202_v42 = vsel %vm200_vm3, %v199_v40, %v201_v41 }
  0xcd   :  { %486 = vmatmul.mubr.f32.vlgmr.msra.gmra.mxu0 %v202_v42 }
 0x18d   :  { %v292_v48 = vpop.f32.mrf.mxu0 }
 0x18e   :  { %v293_v49 = vadd.f32 %v403_v47, %v292_v48 }
 0x18f   :  { %v487_v50 = vpop.f32.mrf.mxu0 }
 0x190   :  { %vm296_vm4 = vcmp.gt.f32.partialorder %v293_v49, 0.0  ;;  %v297_v51 = vmul.f32 0.01, %v293_v49 }
 0x192   :  { %v298_v52 = vsel %vm296_vm4, %v293_v49, %v297_v51 }
 0x193   :  { %521 = vmatmul.mubr.f32.vlgmr.msra.gmra.mxu1 %v298_v52 }
 0x253   :  { %v388_v54 = vpop.f32.mrf.mxu1 }
 0x254   :  { %v389_v55 = vadd.f32 %v404_v53, %v388_v54 }
 0x255   :  { %v522_v56 = vpop.f32.mrf.mxu1 }
 0x256   :  { %393 = vst.msk [vmem:[%s746_s9] sm:$0xff] %vm392_vm5, %v389_v55 }

</bundles_post_ra>
